<compile_context>
chip_gen: v7x
topology: tpu7x:2x2x1
jax: 0.10.0
libtpu: 0.0.40
codegen_flags: <defaults>
</compile_context>

<pallas_src>
import functools

import jax
import jax.numpy as jnp
from jax.experimental import pallas as pl
from jax.experimental.pallas import tpu as pltpu


TEMPERATURE = 4.0
ALPHA = 0.7


def _round_up(x, m):
    return ((x + m - 1) // m) * m


def _vmem_params():
    """(tile budget bytes, max TB, vmem_limit_bytes) sized per TPU generation."""
    cap = 64 * 1024 * 1024                       # conservative default: v7x per-TC VMEM
    try:
        cap = int(pltpu.get_tpu_info().vmem_capacity_bytes)
    except Exception:
        pass
    if cap >= 100 * 1024 * 1024:                 # v5e / v6e: 128 MiB physical VMEM
        return 40 * 1024 * 1024, 1024, 80 * 1024 * 1024
    # v7x-class: 64 MiB per TensorCore -> leave headroom for the f32 temporaries
    return 20 * 1024 * 1024, 512, 40 * 1024 * 1024


def _choose_batch_tile(b, c, itemsize, budget, cap):
    """Batch tile sized against input double-buffers + live f32 intermediates."""
    per_row = (2 * 2 * c * max(int(itemsize), 1)   # student+teacher, double-buffered DMA
               + 8 * c * 4                         # ~live f32 (TB, C) temporaries
               + 2 * 128 * 4)                      # labels block (lane-padded), 2 buffers
    tb = budget // per_row if per_row else cap
    tb = int(max(8, min(cap, (tb // 8) * 8)))      # multiple of 8, generation cap
    tb = min(tb, max(8, (b // 8) * 8))             # keep block start inside the array
    if b >= 16:                                    # >=2 tiles so v7x can use both TCs
        tb = min(tb, _round_up((b + 1) // 2, 8))
    return max(8, tb)


def _int_pow(x, n):
    """x ** n for a static positive Python int n, via repeated squaring."""
    result = None
    base = x
    while n:
        if n & 1:
            result = base if result is None else result * base
        n >>= 1
        if n:
            base = base * base
    return result


def _kd_tile_kernel(student_ref, teacher_ref, labels_ref, out_ref, *,
                    batch, temperature, ragged, int_temp):
    s = student_ref[...].astype(jnp.float32)       # (TB, C)
    t = teacher_ref[...].astype(jnp.float32)       # (TB, C)
    lbl = labels_ref[...]                          # (TB, 1) int32
    tb, c = s.shape

    vmask = None
    if ragged:
        # Rows past the real batch (ragged last tile) hold undefined data.
        # Zero them *before* exp/log so Inf/NaN never enters the reductions,
        # then mask their contribution out of the row sums.
        row = jax.lax.broadcasted_iota(jnp.int32, (tb, 1), 0)
        gid = pl.program_id(0) * tb + row
        valid = gid < batch                        # (TB, 1) bool
        s = jnp.where(valid, s, 0.0)
        t = jnp.where(valid, t, 0.0)
        vmask = valid.astype(jnp.float32)

    inv_t = 1.0 / temperature

    # ---- shared shifted student logits (max is monotone under /T) ----
    s_max = jnp.max(s, axis=1, keepdims=True)
    s_shift = s - s_max
    sT_shift = s_shift * inv_t
    es = jnp.exp(sT_shift)                         # exp(s_shift / T)
    log_zs = jnp.log(jnp.sum(es, axis=1, keepdims=True))

    # ---- cross entropy: ce_row = logsumexp(s) - s[label] ----
    if int_temp is not None:
        exp_s = _int_pow(es, int_temp)             # exp(s_shift) from es: no 2nd exp pass
    else:
        exp_s = jnp.exp(s_shift)
    lse = jnp.log(jnp.sum(exp_s, axis=1, keepdims=True))
    col = jax.lax.broadcasted_iota(jnp.int32, (tb, c), 1)
    s_lbl = jnp.sum(jnp.where(col == lbl, s_shift, 0.0), axis=1, keepdims=True)
    ce_row = lse - s_lbl                           # (TB, 1)

    # ---- KD: sum_c softmax(t/T) * (log_softmax(t/T) - log_softmax(s/T)) ----
    t_max = jnp.max(t, axis=1, keepdims=True)
    tT_shift = (t - t_max) * inv_t
    et = jnp.exp(tT_shift)
    denom = jnp.sum(et, axis=1, keepdims=True)
    log_zt = jnp.log(denom)
    # Per-row constant (log_zs - log_zt) pulled out of the (TB, C) pass.
    kd_dot = jnp.sum(et * (tT_shift - sT_shift), axis=1, keepdims=True)
    kd_row = kd_dot / denom + (log_zs - log_zt)    # (TB, 1)

    if vmask is not None:
        ce_row = ce_row * vmask
        kd_row = kd_row * vmask

    # Per-tile partial sums -> one lane-dense (8, 128) block per tile.
    ce_sum = jnp.sum(ce_row)
    kd_sum = jnp.sum(kd_row)
    lane = jax.lax.broadcasted_iota(jnp.int32, (8, 128), 1)
    sub = jax.lax.broadcasted_iota(jnp.int32, (8, 128), 0)
    first = sub == 0
    out_ref[...] = jnp.where(first & (lane == 0), ce_sum,
                             jnp.where(first & (lane == 1), kd_sum, 0.0))


def knowledge_distillation_loss(student_logits, teacher_logits, labels,
                                temperature=TEMPERATURE, alpha=ALPHA):
    """Pallas-backed equivalent of KnowledgeDistillationLoss.forward."""
    b, c = student_logits.shape
    itemsize = jnp.dtype(student_logits.dtype).itemsize

    budget, tb_cap, vmem_limit = _vmem_params()
    tb = _choose_batch_tile(b, c, itemsize, budget, tb_cap)
    num_tiles = pl.cdiv(b, tb)
    ragged = (b % tb) != 0

    t_f = float(temperature)
    int_temp = int(t_f) if (t_f.is_integer() and 1.0 <= t_f <= 8.0) else None

    labels2d = labels.astype(jnp.int32).reshape(b, 1)

    kernel = functools.partial(_kd_tile_kernel, batch=b, temperature=t_f,
                               ragged=ragged, int_temp=int_temp)

    partials = pl.pallas_call(
        kernel,
        out_shape=jax.ShapeDtypeStruct((num_tiles * 8, 128), jnp.float32),
        grid=(num_tiles,),
        in_specs=[
            pl.BlockSpec((tb, c), lambda i: (i, 0)),
            pl.BlockSpec((tb, c), lambda i: (i, 0)),
            pl.BlockSpec((tb, 1), lambda i: (i, 0)),
        ],
        out_specs=pl.BlockSpec((8, 128), lambda i: (i, 0)),
        compiler_params=pltpu.CompilerParams(
            dimension_semantics=("parallel",),     # v7x: shard tiles over both TCs
            vmem_limit_bytes=vmem_limit,
        ),
        cost_estimate=pl.CostEstimate(
            flops=14 * b * c,
            transcendentals=(2 if int_temp is not None else 3) * b * c,
            bytes_accessed=(2 * b * c * int(itemsize) + b * 4
                            + num_tiles * 8 * 128 * 4),
        ),
    )(student_logits, teacher_logits, labels2d)

    tot = jnp.sum(partials, axis=0)                # (128,): lane 0 = CE, lane 1 = KD
    ce_loss = tot[0] / b
    kd_loss = tot[1] / b * (t_f ** 2)
    return alpha * kd_loss + (1.0 - alpha) * ce_loss


def _reference(student_logits, teacher_logits, labels,
               temperature=TEMPERATURE, alpha=ALPHA):
    """Pure-JAX reference mirroring the PyTorch semantics."""
    s = student_logits.astype(jnp.float32)
    t = teacher_logits.astype(jnp.float32)
    log_p = jax.nn.log_softmax(s, axis=1)
    ce = -jnp.mean(jnp.take_along_axis(log_p, labels[:, None], axis=1))
    log_ps = jax.nn.log_softmax(s / temperature, axis=1)
    log_pt = jax.nn.log_softmax(t / temperature, axis=1)
    pt = jnp.exp(log_pt)
    kd = jnp.sum(pt * (log_pt - log_ps)) / s.shape[0] * temperature ** 2
    return alpha * kd + (1.0 - alpha) * ce


if __name__ == "__main__":
    key = jax.random.PRNGKey(0)

    # Primary small test shape.
    k1, k2, k3 = jax.random.split(key, 3)
    B, C = 8, 32
    student = jax.random.normal(k1, (B, C), dtype=jnp.float32) * 2.0
    teacher = jax.random.normal(k2, (B, C), dtype=jnp.float32) * 2.0
    labels = jax.random.randint(k3, (B,), 0, C, dtype=jnp.int32)

    loss = jax.block_until_ready(knowledge_distillation_loss(student, teacher, labels))
    ref = _reference(student, teacher, labels)
    assert jnp.allclose(loss, ref, rtol=1e-5, atol=1e-5), (loss, ref)

    # Second shape exercising the ragged last tile / in-kernel row masking.
    k4, k5, k6 = jax.random.split(jax.random.PRNGKey(1), 3)
    B2, C2 = 13, 40
    student2 = jax.random.normal(k4, (B2, C2), dtype=jnp.float32) * 2.0
    teacher2 = jax.random.normal(k5, (B2, C2), dtype=jnp.float32) * 2.0
    labels2 = jax.random.randint(k6, (B2,), 0, C2, dtype=jnp.int32)

    loss2 = jax.block_until_ready(knowledge_distillation_loss(student2, teacher2, labels2))
    ref2 = _reference(student2, teacher2, labels2)
    assert jnp.allclose(loss2, ref2, rtol=1e-5, atol=1e-5), (loss2, ref2)

    print("KERNEL_OK")
</pallas_src>

<mosaic_0001>
module attributes {stable_mosaic.version = 11 : i64} {
  func.func @_kd_tile_kernel(%arg0: i32, %arg1: memref<8x32xf32, #tpu.memory_space<vmem>>, %arg2: memref<8x32xf32, #tpu.memory_space<vmem>>, %arg3: memref<8x1xi32, #tpu.memory_space<vmem>>, %arg4: memref<8x128xf32, #tpu.memory_space<vmem>>) attributes {dimension_semantics = [#tpu.dimension_semantics<parallel>], iteration_bounds = array<i64: 1>, scalar_prefetch = 0 : i64, scratch_operands = 0 : i64, tpu.core_type = #tpu.core_type<tc>, window_params = [{transform_indices = @transform_0, window_bounds = array<i64: 8, 32>}, {transform_indices = @transform_1, window_bounds = array<i64: 8, 32>}, {transform_indices = @transform_2, window_bounds = array<i64: 8, 1>}, {transform_indices = @transform_3, window_bounds = array<i64: 8, 128>}]} {
    %c0 = arith.constant 0 : index
    %c0_0 = arith.constant 0 : index
    %0 = vector.load %arg1[%c0, %c0_0] : memref<8x32xf32, #tpu.memory_space<vmem>>, vector<8x32xf32>
    %c0_1 = arith.constant 0 : index
    %c0_2 = arith.constant 0 : index
    %1 = vector.load %arg2[%c0_1, %c0_2] : memref<8x32xf32, #tpu.memory_space<vmem>>, vector<8x32xf32>
    %c0_3 = arith.constant 0 : index
    %c0_4 = arith.constant 0 : index
    %2 = vector.load %arg3[%c0_3, %c0_4] : memref<8x1xi32, #tpu.memory_space<vmem>>, vector<8x1xi32>
    %cst = arith.constant dense<0xFF800000> : vector<8xf32>
    %3 = vector.multi_reduction <maximumf>, %0, %cst [1] : vector<8x32xf32> to vector<8xf32>
    %4 = vector.shape_cast %3 : vector<8xf32> to vector<8x1xf32>
    %5 = vector.broadcast %4 : vector<8x1xf32> to vector<8x32xf32>
    %6 = arith.subf %0, %5 : vector<8x32xf32>
    %cst_5 = arith.constant 2.500000e-01 : f32
    %7 = vector.broadcast %cst_5 : f32 to vector<8x32xf32>
    %8 = arith.mulf %6, %7 : vector<8x32xf32>
    %9 = math.exp %8 : vector<8x32xf32>
    %cst_6 = arith.constant dense<0.000000e+00> : vector<8xf32>
    %10 = vector.multi_reduction <add>, %9, %cst_6 [1] : vector<8x32xf32> to vector<8xf32>
    %11 = vector.shape_cast %10 : vector<8xf32> to vector<8x1xf32>
    %12 = math.log %11 : vector<8x1xf32>
    %13 = arith.mulf %9, %9 : vector<8x32xf32>
    %14 = arith.mulf %13, %13 : vector<8x32xf32>
    %cst_7 = arith.constant dense<0.000000e+00> : vector<8xf32>
    %15 = vector.multi_reduction <add>, %14, %cst_7 [1] : vector<8x32xf32> to vector<8xf32>
    %16 = vector.shape_cast %15 : vector<8xf32> to vector<8x1xf32>
    %17 = math.log %16 : vector<8x1xf32>
    %18 = tpu.iota {dimensions = array<i32: 1>} : vector<8x32xi32>
    %19 = vector.broadcast %2 : vector<8x1xi32> to vector<8x32xi32>
    %20 = arith.cmpi eq, %18, %19 : vector<8x32xi32>
    %cst_8 = arith.constant 0.000000e+00 : f32
    %21 = vector.broadcast %cst_8 : f32 to vector<8x32xf32>
    %22 = arith.select %20, %6, %21 : vector<8x32xi1>, vector<8x32xf32>
    %cst_9 = arith.constant dense<0.000000e+00> : vector<8xf32>
    %23 = vector.multi_reduction <add>, %22, %cst_9 [1] : vector<8x32xf32> to vector<8xf32>
    %24 = vector.shape_cast %23 : vector<8xf32> to vector<8x1xf32>
    %25 = arith.subf %17, %24 : vector<8x1xf32>
    %cst_10 = arith.constant dense<0xFF800000> : vector<8xf32>
    %26 = vector.multi_reduction <maximumf>, %1, %cst_10 [1] : vector<8x32xf32> to vector<8xf32>
    %27 = vector.shape_cast %26 : vector<8xf32> to vector<8x1xf32>
    %28 = vector.broadcast %27 : vector<8x1xf32> to vector<8x32xf32>
    %29 = arith.subf %1, %28 : vector<8x32xf32>
    %cst_11 = arith.constant 2.500000e-01 : f32
    %30 = vector.broadcast %cst_11 : f32 to vector<8x32xf32>
    %31 = arith.mulf %29, %30 : vector<8x32xf32>
    %32 = math.exp %31 : vector<8x32xf32>
    %cst_12 = arith.constant dense<0.000000e+00> : vector<8xf32>
    %33 = vector.multi_reduction <add>, %32, %cst_12 [1] : vector<8x32xf32> to vector<8xf32>
    %34 = vector.shape_cast %33 : vector<8xf32> to vector<8x1xf32>
    %35 = math.log %34 : vector<8x1xf32>
    %36 = arith.subf %31, %8 : vector<8x32xf32>
    %37 = arith.mulf %32, %36 : vector<8x32xf32>
    %cst_13 = arith.constant dense<0.000000e+00> : vector<8xf32>
    %38 = vector.multi_reduction <add>, %37, %cst_13 [1] : vector<8x32xf32> to vector<8xf32>
    %39 = vector.shape_cast %38 : vector<8xf32> to vector<8x1xf32>
    %40 = arith.divf %39, %34 : vector<8x1xf32>
    %41 = arith.subf %12, %35 : vector<8x1xf32>
    %42 = arith.addf %40, %41 : vector<8x1xf32>
    %43 = vector.shape_cast %25 : vector<8x1xf32> to vector<1x8x1xf32>
    %cst_14 = arith.constant dense<0.000000e+00> : vector<1xf32>
    %44 = vector.multi_reduction <add>, %43, %cst_14 [1, 2] : vector<1x8x1xf32> to vector<1xf32>
    %45 = vector.shape_cast %44 : vector<1xf32> to vector<1x1x1xf32>
    %46 = vector.extract %45[0, 0, 0] : f32 from vector<1x1x1xf32>
    %47 = vector.shape_cast %42 : vector<8x1xf32> to vector<1x8x1xf32>
    %cst_15 = arith.constant dense<0.000000e+00> : vector<1xf32>
    %48 = vector.multi_reduction <add>, %47, %cst_15 [1, 2] : vector<1x8x1xf32> to vector<1xf32>
    %49 = vector.shape_cast %48 : vector<1xf32> to vector<1x1x1xf32>
    %50 = vector.extract %49[0, 0, 0] : f32 from vector<1x1x1xf32>
    %51 = tpu.iota {dimensions = array<i32: 1>} : vector<8x128xi32>
    %52 = tpu.iota {dimensions = array<i32: 0>} : vector<8x128xi32>
    %c0_i32 = arith.constant 0 : i32
    %53 = vector.broadcast %c0_i32 : i32 to vector<8x128xi32>
    %54 = arith.cmpi eq, %52, %53 : vector<8x128xi32>
    %c0_i32_16 = arith.constant 0 : i32
    %55 = vector.broadcast %c0_i32_16 : i32 to vector<8x128xi32>
    %56 = arith.cmpi eq, %51, %55 : vector<8x128xi32>
    %57 = arith.andi %54, %56 : vector<8x128xi1>
    %c1_i32 = arith.constant 1 : i32
    %58 = vector.broadcast %c1_i32 : i32 to vector<8x128xi32>
    %59 = arith.cmpi eq, %51, %58 : vector<8x128xi32>
    %60 = arith.andi %54, %59 : vector<8x128xi1>
    %cst_17 = arith.constant 0.000000e+00 : f32
    %61 = vector.broadcast %50 : f32 to vector<8x128xf32>
    %62 = vector.broadcast %cst_17 : f32 to vector<8x128xf32>
    %63 = arith.select %60, %61, %62 : vector<8x128xi1>, vector<8x128xf32>
    %64 = vector.broadcast %46 : f32 to vector<8x128xf32>
    %65 = arith.select %57, %64, %63 : vector<8x128xi1>, vector<8x128xf32>
    %c0_18 = arith.constant 0 : index
    %c0_19 = arith.constant 0 : index
    %66 = vector.load %arg4[%c0_18, %c0_19] : memref<8x128xf32, #tpu.memory_space<vmem>>, vector<8x128xf32>
    tpu.vector_store %arg4[%c0_18, %c0_19], %65 {strides = array<i32>} : memref<8x128xf32, #tpu.memory_space<vmem>>, vector<8x128xf32>,
    return
  }
  func.func @transform_0(%arg0: i32) -> (i32, i32) {
    %c0_i32 = arith.constant 0 : i32
    %c0_i32_0 = arith.constant 0 : i32
    return %arg0, %c0_i32 : i32, i32
  }
  func.func @transform_1(%arg0: i32) -> (i32, i32) {
    %c0_i32 = arith.constant 0 : i32
    %c0_i32_0 = arith.constant 0 : i32
    return %arg0, %c0_i32 : i32, i32
  }
  func.func @transform_2(%arg0: i32) -> (i32, i32) {
    %c0_i32 = arith.constant 0 : i32
    %c0_i32_0 = arith.constant 0 : i32
    return %arg0, %c0_i32 : i32, i32
  }
  func.func @transform_3(%arg0: i32) -> (i32, i32) {
    %c0_i32 = arith.constant 0 : i32
    %c0_i32_0 = arith.constant 0 : i32
    return %arg0, %c0_i32 : i32, i32
  }
}

</mosaic_0001>

<bundles_post_ra>
// kernel: tpu_custom_call.1
= control target key start
LH: loop header
LB: loop body
LE: loop exit
PB: predicated region body
PF: predicated region fallthrough
CT: control target
= control target key end

     0   :  { %8 = vsyncpa [#allocation3], 0  ;;  %s259_s0 = inlined_call_operand.vmem [shape: f32[8,32], index: 0, kind: input, shape index: {}]   ;;  %s260_s1 = inlined_call_operand.hbm [shape: f32[8,32], index: 1, kind: input, shape index: {}]   ;;  %s261_s2 = inlined_call_operand.vmem [shape: s32[8,1], index: 2, kind: input, shape index: {}]   ;;  %s262_s3 = inlined_call_operand.hbm [shape: f32[8,128], index: 3, kind: output, shape index: {}]  }
   0x1   :  { %9 = vsyncpa [#allocation4], 0  ;;  %s199_s12 = smov [#allocation2]   ;;  %s151_s16 = scalar_lea.hbm %s260_s1, 128 }
   0x2   :  { %s18_s13 = sshll.u32 %s199_s12, 4  ;;  %p152_p0 = scmp.ne.s32.totalorder %s260_s1, %s151_s16  ;;  %s19_s13 = int_to_ptr.vmem [resolvable:$true] %s18_s13 }
   0x3   :  { %p155_p1 = scmp.lt.u32.totalorder %s151_s16, %s260_s1 }
   0x5   :  { %p157_p2 = pnand %p155_p1, %p152_p0 }
   0x7   :  { %160 = shalt.err (!%p157_p2)
}
   0x8   :  { %s161_s21 = scalar_lea.vmem %s19_s13, 128  ;;  %p166_p4 = scmp.lt.s32.totalorder %s19_s13, %s19_s13 }
   0x9   :  { %p162_p3 = scmp.ne.s32.totalorder %s19_s13, %s161_s21  ;;  %p167_p5 = scmp.lt.s32.totalorder %s161_s21, %s161_s21 }
   0xb   :  { %p168_p6 = por %p167_p5, %p166_p4 }
   0xd   :  { %p169_p7 = pnand %p168_p6, %p162_p3 }
   0xf   :  { %172 = shalt.err (!%p169_p7)
}
  0x10   :  { %21 = dma.hbm_to_vmem [thread:$0]  %s260_s1, 128, %s19_s13, [#allocation3]  }
  0x11   :  { %195 = dma.done.wait [#allocation3], 128  }
  0x12   :  { %196 = vsyncadd [#allocation3], 4294967168  ;;  %v200_v0 = vmov 0   ;;  %vm30_vm0 = vcmask 261120   ;;  %v27_v1 = vld [vmem:[%s259_s0] sm:$0xff]  ;;  %v50_v17 = vlaneseq  ;;  %vm82_vm2 = vcmask 7168  }
  0x13   :  { %137 = vset.pattern.permute.xlu1 %v200_v0  ;;  %138 = vset.pattern.permute.xlu0 %v200_v0  ;;  %v28_v2 = vld [vmem:[#allocation2] sm:$0xff]  ;;  %v31_v4 = vsel %vm30_vm0, %v27_v1, -inf  ;;  %s201_s1 = smov [#allocation5]  }
  0x14   :  { %v29_v3 = vld [vmem:[%s261_s2] sm:$0xff]  ;;  %32 = vmax.xlane.f32.xlu0 %v31_v4  ;;  %v61_v5 = vsel %vm30_vm0, %v28_v2, -inf  ;;  %v51_v21 = vand.u32 127, %v50_v17  ;;  %v104_v61 = vshrl.u32 %v50_v17, 7  ;;  %s121_s2 = sshll.u32 %s201_s1, 4  ;;  %s122_s2 = int_to_ptr.vmem [resolvable:$true] %s121_s2 }
  0x15   :  { %53 = vperm.xlu1 %137, %v29_v3   ;;  %s173_s29 = scalar_lea.vmem %s122_s2, 128  ;;  %p178_p9 = scmp.lt.s32.totalorder %s122_s2, %s122_s2 }
  0x16   :  { %vm105_vm3 = vcmp.eq.s32.totalorder %v104_v61, 0  ;;  %vm108_vm4 = vcmp.eq.s32.totalorder %v51_v21, 1  ;;  %vm106_vm5 = vcmp.eq.s32.totalorder %v51_v21, 0  ;;  %p174_p8 = scmp.ne.s32.totalorder %s122_s2, %s173_s29  ;;  %p179_p10 = scmp.lt.s32.totalorder %s173_s29, %s173_s29 }
  0x17   :  { %vm109_vm6 = vmand %vm105_vm3, %vm108_vm4 }
  0x18   :  { %62 = vmax.xlane.f32.xlu0 %v61_v5  ;;  %vm107_vm7 = vmand %vm105_vm3, %vm106_vm5  ;;  %p180_p11 = por %p179_p10, %p178_p9 }
  0x1a   :  { %p181_p12 = pnand %p180_p11, %p174_p8 }
  0x94   :  { %v54_v23 = vpop.permute.xlu1 %53 }
  0x95   :  { %vm55_vm1 = vcmp.eq.s32.totalorder %v51_v21, %v54_v23 }
  0xa1   :  { %v33_v6 = vpop.xlane.xlu0 %32 }
  0xa2   :  { %v34_v7 = vsub.f32 %v27_v1, %v33_v6 }
  0xa4   :  { %v35_v8 = vmul.f32 0.25, %v34_v7  ;;  %v56_v27 = vsel %vm55_vm1, %v34_v7, 0.0 }
  0xa5   :  { %v63_v9 = vpop.xlane.xlu0 %62  ;;  %v57_v28 = vsel %vm30_vm0, %v56_v27, 0.0 }
  0xa6   :  { %v36_v10 = vmul.f32 1.442695, %v35_v8  ;;  %v64_v11 = vsub.f32 %v28_v2, %v63_v9 }
  0xa8   :  { %139 = vpow2.f32 %v36_v10  ;;  %v65_v12 = vmul.f32 0.25, %v64_v11 }
  0xaa   :  { %v66_v13 = vmul.f32 1.442695, %v65_v12  ;;  %v73_v22 = vsub.f32 %v65_v12, %v35_v8 }
  0xac   :  { %141 = vpow2.f32 %v66_v13 }
  0xb2   :  { %v140_v14 = vpop.eup %139 }
  0xb3   :  { %v38_v15 = vsel %vm30_vm0, %v140_v14, 0.0  ;;  %v43_v16 = vmul.f32 %v140_v14, %v140_v14 }
  0xb4   :  { %39 = vadd.xlane.f32.xlu1 %v38_v15 }
  0xb5   :  { %v44_v20 = vmul.f32 %v43_v16, %v43_v16 }
  0xb6   :  { %v142_v18 = vpop.eup %141 }
  0xb7   :  { %v68_v19 = vsel %vm30_vm0, %v142_v18, 0.0  ;;  %v45_v24 = vsel %vm30_vm0, %v44_v20, 0.0  ;;  %v74_v25 = vmul.f32 %v142_v18, %v73_v22 }
  0xb8   :  { %69 = vadd.xlane.f32.xlu0 %v68_v19 }
  0xb9   :  { %v75_v26 = vsel %vm30_vm0, %v74_v25, 0.0 }
  0xbc   :  { %46 = vadd.xlane.f32.xlu0 %v45_v24 }
  0xc0   :  { %76 = vadd.xlane.f32.xlu0 %v75_v26 }
  0xc4   :  { %58 = vadd.xlane.f32.xlu0 %v57_v28 }
 0x141   :  { %v40_v29 = vpop.xlane.xlu1 %39 }
 0x142   :  { %143 = vlog2.f32 %v40_v29 }
 0x145   :  { %v70_v30 = vpop.xlane.xlu0 %69 }
 0x146   :  { %145 = vlog2.f32 %v70_v30 }
 0x147   :  { %147 = vrcp.f32 %v70_v30 }
 0x149   :  { %v47_v31 = vpop.xlane.xlu0 %46 }
 0x14a   :  { %149 = vlog2.f32 %v47_v31 }
 0x14c   :  { %v144_v32 = vpop.eup %143 }
 0x14d   :  { %v77_v34 = vpop.xlane.xlu0 %76  ;;  %v42_v37 = vmul.f32 0.6931472, %v144_v32 }
 0x150   :  { %v146_v33 = vpop.eup %145 }
 0x151   :  { %v72_v35 = vmul.f32 0.6931472, %v146_v33  ;;  %v148_v36 = vpop.eup %147  ;;  %v59_v41 = vpop.xlane.xlu0 %58 }
 0x152   :  { %v79_v42 = vmul.f32 %v148_v36, %v77_v34 }
 0x153   :  { %v80_v40 = vsub.f32 %v42_v37, %v72_v35 }
 0x154   :  { %v150_v38 = vpop.eup %149 }
 0x155   :  { %v49_v39 = vmul.f32 0.6931472, %v150_v38  ;;  %v81_v45 = vadd.f32 %v80_v40, %v79_v42 }
 0x157   :  { %v60_v43 = vsub.f32 %v49_v39, %v59_v41  ;;  %v93_v46 = vsel %vm82_vm2, %v81_v45, 0.0 }
 0x159   :  { %v83_v44 = vsel %vm82_vm2, %v60_v43, 0.0 }
 0x15a   :  { %84 = vadd.xlane.f32.xlu0 %v83_v44 }
 0x15e   :  { %94 = vadd.xlane.f32.xlu0 %v93_v46 }
 0x1e7   :  { %v85_v47 = vpop.xlane.xlu0 %84 }
 0x1e8   :  { %v86_v48 = vrot.slane %v85_v47, 4 }
 0x1ea   :  { %v87_v49 = vadd.f32 %v86_v48, %v85_v47 }
 0x1eb   :  { %v95_v50 = vpop.xlane.xlu0 %94 }
 0x1ec   :  { %v88_v51 = vrot.slane %v87_v49, 2  ;;  %v96_v52 = vrot.slane %v95_v50, 4 }
 0x1ee   :  { %v97_v53 = vadd.f32 %v96_v52, %v95_v50  ;;  %v89_v54 = vadd.f32 %v88_v51, %v87_v49 }
 0x1f0   :  { %v98_v55 = vrot.slane %v97_v53, 2  ;;  %v90_v56 = vrot.slane %v89_v54, 1 }
 0x1f2   :  { %v99_v57 = vadd.f32 %v98_v55, %v97_v53  ;;  %v91_v58 = vadd.f32 %v90_v56, %v89_v54 }
 0x1f4   :  { %130 = vpush %v91_v58  ;;  %v100_v59 = vrot.slane %v99_v57, 1 }
 0x1f6   :  { %v101_v60 = vadd.f32 %v100_v59, %v99_v57 }
 0x1f8   :  { %132 = vpush %v101_v60 }
 0x225   :  { %s131_s0 = spop %130 }
 0x226   :  { %v112_v63 = vstv %s131_s0 }
 0x229   :  { %s133_s28 = spop %132 }
 0x22a   :  { %v110_v62 = vstv %s133_s28 }
 0x22b   :  { %v111_v0 = vsel %vm109_vm6, %v110_v62, 0.0 }
 0x22c   :  { %v113_v1 = vsel %vm107_vm7, %v112_v63, %v111_v0 }
 0x22d   :  { %114 = vst [vmem:[#allocation5] sm:$0xff] %v113_v1 }
 0x22e   :  { %184 = shalt.err (!%p181_p12)
}
 0x22f   :  { %s185_s5 = scalar_lea.hbm %s262_s3, 128 }
 0x230   :  { %p186_p13 = scmp.ne.s32.totalorder %s262_s3, %s185_s5  ;;  %p189_p0 = scmp.lt.u32.totalorder %s185_s5, %s262_s3 }
 0x232   :  { %p191_p1 = pnand %p189_p0, %p186_p13 }
 0x234   :  { %194 = shalt.err (!%p191_p1)
}
 0x235   :  { %124 = dma.vmem_to_hbm [thread:$0]  %s122_s2, 128, %s262_s3, [#allocation4]  }
 0x236   :  { %197 = dma.done.wait [#allocation4], 128  }
 0x237   :  { %198 = vsyncadd [#allocation4], 4294967168 }
 0x238   :  { %128 = vsyncpa [#allocation3], 1 }
 0x239   :  { %129 = vsyncpa [#allocation4], 1 }

</bundles_post_ra>
